<compile_context>
chip_gen: v6e
topology: v6e:2x2x1
jax: 0.10.0
libtpu: 0.0.40
codegen_flags: <defaults>
</compile_context>

<pallas_src>
import jax
import jax.numpy as jnp
from jax.experimental import pallas as pl
from jax.experimental.pallas import tpu as pltpu


def _round_up(x, m):
    return ((x + m - 1) // m) * m


def _cdiv(a, b):
    return (a + b - 1) // b


def _pick_tile(rows, tile_default):
    """rows is a multiple of 8.  Pick a row tile that is a multiple of 8,
    never exceeds tile_default, and gives >= 2 grid steps whenever rows allow
    it (so the 'parallel' grid axis can be sharded across both v7x cores)."""
    tile = min(tile_default, rows)
    if rows >= 16:
        tile = min(tile, _round_up(_cdiv(rows, 2), 8))
    return max(tile, 8)


# ----------------------------------------------------------------------------
# Kernel 1: input_proj  (nn.Conv2d(C_in, hidden_dim, kernel_size=1))
# A 1x1 conv == per-pixel matmul over channels; rows are flattened B*H*W.
# ----------------------------------------------------------------------------
def _input_proj_kernel(x_ref, w_ref, b_ref, o_ref):
    # x_ref: (TILE_M, Cin) bf16, w_ref: (Cin, D) bf16, b_ref: (1, D) f32
    acc = jnp.dot(x_ref[...], w_ref[...], preferred_element_type=jnp.float32)
    o_ref[...] = (acc + b_ref[...]).astype(o_ref.dtype)


def input_proj(x2d, w_bf, b, *, tile_m=1024, out_dtype=jnp.bfloat16):
    """x2d: [M, Cin] (M = B*H*W)  ->  [M, D] (bf16 writeback, f32 accumulate)."""
    M, Cin = x2d.shape
    D = w_bf.shape[1]

    # Pad rows only to a multiple of 8; the (possibly partial) last grid step
    # is masked by Pallas, so no full-tile garbage rows hit HBM.
    M8 = _round_up(M, 8)
    if M8 != M:
        x2d = jnp.pad(x2d, ((0, M8 - M), (0, 0)))
    tile_m = _pick_tile(M8, tile_m)
    grid_m = _cdiv(M8, tile_m)

    x_bf = x2d.astype(jnp.bfloat16)

    cost = pl.CostEstimate(
        flops=2 * M8 * Cin * D,
        transcendentals=0,
        bytes_accessed=2 * M8 * Cin + 2 * Cin * D + 4 * D + 2 * M8 * D,
    )

    out = pl.pallas_call(
        _input_proj_kernel,
        out_shape=jax.ShapeDtypeStruct((M8, D), out_dtype),
        grid=(grid_m,),
        in_specs=[
            pl.BlockSpec((tile_m, Cin), lambda i: (i, 0)),
            # Weight / bias blocks are grid-invariant; Pallas skips the
            # re-DMA since the block index never changes.
            pl.BlockSpec((Cin, D), lambda i: (0, 0)),
            pl.BlockSpec((1, D), lambda i: (0, 0)),
        ],
        out_specs=pl.BlockSpec((tile_m, D), lambda i: (i, 0)),
        compiler_params=pltpu.CompilerParams(
            dimension_semantics=("parallel",),
            vmem_limit_bytes=32 * 1024 * 1024,
        ),
        cost_estimate=cost,
    )(x_bf, w_bf, b)
    return out[:M]


# ----------------------------------------------------------------------------
# Kernel 2: fused prediction heads, gridded over rows N = L*B*Q.
#   One wide matmul:  hs @ [w1_p1 | w1_p2 | p1_cls | p2_cls | action_cls]
#   then two small per-head MLP tails (layers 2/3) as explicit dots,
#   one lane-dense (TILE_N, W_PAD) full-tile store of the packed results.
# ----------------------------------------------------------------------------
def _make_heads_kernel(wc, d, w_pad):
    n_zero = w_pad - wc - 8

    def kernel(hs_ref, wf_ref, bf_ref,
               w2a_ref, b2a_ref, w2b_ref, b2b_ref,
               w3a_ref, b3a_ref, w3b_ref, b3b_ref, o_ref):
        hs = hs_ref[...]                                    # (TILE_N, D) bf16

        # One wide MXU pass: [box1.L1 | box2.L1 | p1_cls | p2_cls | act_cls].
        z = jnp.dot(hs, wf_ref[...], preferred_element_type=jnp.float32)
        z = z + bf_ref[...]
        h1a = jnp.maximum(z[:, 0:d], 0.0).astype(jnp.bfloat16)
        h1b = jnp.maximum(z[:, d:2 * d], 0.0).astype(jnp.bfloat16)
        cls = z[:, 2 * d:2 * d + wc]                        # (TILE_N, WC) f32

        # Box MLP layer 2 (explicit per-head dots -> straightline vmatmuls).
        h2a = jnp.maximum(
            jnp.dot(h1a, w2a_ref[...], preferred_element_type=jnp.float32)
            + b2a_ref[...], 0.0).astype(jnp.bfloat16)
        h2b = jnp.maximum(
            jnp.dot(h1b, w2b_ref[...], preferred_element_type=jnp.float32)
            + b2b_ref[...], 0.0).astype(jnp.bfloat16)

        # Box MLP layer 3 + sigmoid (EUP).
        boxa = jax.nn.sigmoid(
            jnp.dot(h2a, w3a_ref[...], preferred_element_type=jnp.float32)
            + b3a_ref[...])                                 # (TILE_N, 4)
        boxb = jax.nn.sigmoid(
            jnp.dot(h2b, w3b_ref[...], preferred_element_type=jnp.float32)
            + b3b_ref[...])                                 # (TILE_N, 4)

        # Assemble slab in registers, single unmasked full-tile store.
        parts = [cls, boxa, boxb]
        if n_zero > 0:
            parts.append(jnp.zeros((hs.shape[0], n_zero), jnp.float32))
        o_ref[...] = jnp.concatenate(parts, axis=-1)

    return kernel


def run_heads(hs_bf, prep, *, tile_n=1024):
    """hs_bf: [N, D] bf16 -> (p1_logits, p1_boxes, p2_logits, p2_boxes, a_logits)."""
    N, D = hs_bf.shape
    C1, A1 = prep["C1"], prep["A1"]
    WC = 2 * C1 + A1                     # width of fused classification output
    WF = 2 * D + WC                      # width of fused first-layer output
    W_PAD = _round_up(WC + 8, 128)       # lane-dense output slab width

    N8 = _round_up(N, 8)
    if N8 != N:
        hs_bf = jnp.pad(hs_bf, ((0, N8 - N), (0, 0)))
    tile_n = _pick_tile(N8, tile_n)
    grid_n = _cdiv(N8, tile_n)

    def const(i):
        return (0, 0)

    in_specs = [
        pl.BlockSpec((tile_n, D), lambda i: (i, 0)),   # hs tile (pipelined)
        pl.BlockSpec((D, WF), const),                  # fused L1 + cls weight
        pl.BlockSpec((1, WF), const),                  # fused L1 + cls bias
        pl.BlockSpec((D, D), const),                   # box1 layer 2 W
        pl.BlockSpec((1, D), const),                   # box1 layer 2 b
        pl.BlockSpec((D, D), const),                   # box2 layer 2 W
        pl.BlockSpec((1, D), const),                   # box2 layer 2 b
        pl.BlockSpec((D, 4), const),                   # box1 layer 3 W
        pl.BlockSpec((1, 4), const),                   # box1 layer 3 b
        pl.BlockSpec((D, 4), const),                   # box2 layer 3 W
        pl.BlockSpec((1, 4), const),                   # box2 layer 3 b
    ]

    flops = 2 * N8 * D * WF + 4 * N8 * D * D + 16 * N8 * D
    bytes_accessed = (
        2 * N8 * D                                     # hs (bf16)
        + 2 * (D * WF + 2 * D * D + 2 * D * 4)         # weights (bf16)
        + 4 * (WF + 2 * D + 8)                         # biases (f32)
        + 4 * N8 * W_PAD                               # output slab (f32)
    )
    cost = pl.CostEstimate(flops=flops, transcendentals=8 * N8,
                           bytes_accessed=bytes_accessed)

    slab = pl.pallas_call(
        _make_heads_kernel(WC, D, W_PAD),
        out_shape=jax.ShapeDtypeStruct((N8, W_PAD), jnp.float32),
        grid=(grid_n,),
        in_specs=in_specs,
        out_specs=pl.BlockSpec((tile_n, W_PAD), lambda i: (i, 0)),
        compiler_params=pltpu.CompilerParams(
            dimension_semantics=("parallel",),
            vmem_limit_bytes=32 * 1024 * 1024,
        ),
        cost_estimate=cost,
    )(hs_bf, prep["w_fused"], prep["b_fused"],
      prep["w2a"], prep["b2a"], prep["w2b"], prep["b2b"],
      prep["w3a"], prep["b3a"], prep["w3b"], prep["b3b"])

    slab = slab[:N]
    p1_logits = slab[:, 0:C1]
    p2_logits = slab[:, C1:2 * C1]
    a_logits = slab[:, 2 * C1:WC]
    p1_boxes = slab[:, WC:WC + 4]
    p2_boxes = slab[:, WC + 4:WC + 8]
    return p1_logits, p1_boxes, p2_logits, p2_boxes, a_logits


# ----------------------------------------------------------------------------
# Parameter construction + one-time packing (hoisted out of the per-call path).
# ----------------------------------------------------------------------------
def make_params(key, c_backbone, hidden_dim, num_classes, num_actions,
                num_queries):
    def nxt():
        nonlocal key
        key, sub = jax.random.split(key)
        return sub

    def w(shape):
        return (0.02 * jax.random.normal(nxt(), shape)).astype(jnp.float32)

    def b(shape):
        return jnp.zeros(shape, jnp.float32)

    C1 = num_classes + 1
    A1 = num_actions + 1
    D = hidden_dim
    return {
        "query_embed": w((num_queries, D)),
        # input_proj: Conv2d(C_in, D, 1) -> weight [Cin, D], bias [1, D]
        "proj_w": w((c_backbone, D)),
        "proj_b": b((1, D)),
        # person1 heads
        "p1c_w": w((D, C1)), "p1c_b": b((1, C1)),
        "p1b_w1": w((D, D)), "p1b_b1": b((1, D)),
        "p1b_w2": w((D, D)), "p1b_b2": b((1, D)),
        "p1b_w3": w((D, 4)), "p1b_b3": b((1, 4)),
        # person2 heads
        "p2c_w": w((D, C1)), "p2c_b": b((1, C1)),
        "p2b_w1": w((D, D)), "p2b_b1": b((1, D)),
        "p2b_w2": w((D, D)), "p2b_b2": b((1, D)),
        "p2b_w3": w((D, 4)), "p2b_b3": b((1, 4)),
        # action head
        "ac_w": w((D, A1)), "ac_b": b((1, A1)),
    }


def prepare_mgtr_params(params):
    """One-time weight fusion + bf16 casting (do NOT redo this per forward)."""
    D = params["proj_w"].shape[1]
    C1 = params["p1c_w"].shape[1]
    A1 = params["ac_w"].shape[1]
    # Fused first MXU pass: [box1.L1 | box2.L1 | p1_cls | p2_cls | act_cls].
    w_fused = jnp.concatenate(
        [params["p1b_w1"], params["p2b_w1"],
         params["p1c_w"], params["p2c_w"], params["ac_w"]], axis=1
    ).astype(jnp.bfloat16)                                    # (D, 2D + WC)
    b_fused = jnp.concatenate(
        [params["p1b_b1"], params["p2b_b1"],
         params["p1c_b"], params["p2c_b"], params["ac_b"]], axis=1
    ).astype(jnp.float32)                                     # (1, 2D + WC)
    return {
        "D": D, "C1": C1, "A1": A1,
        "query_embed": params["query_embed"],
        "proj_w": params["proj_w"].astype(jnp.bfloat16),
        "proj_b": params["proj_b"].astype(jnp.float32),
        "w_fused": w_fused, "b_fused": b_fused,
        "w2a": params["p1b_w2"].astype(jnp.bfloat16), "b2a": params["p1b_b2"],
        "w2b": params["p2b_w2"].astype(jnp.bfloat16), "b2b": params["p2b_b2"],
        "w3a": params["p1b_w3"].astype(jnp.bfloat16), "b3a": params["p1b_b3"],
        "w3b": params["p2b_w3"].astype(jnp.bfloat16), "b3b": params["p2b_b3"],
    }


# ----------------------------------------------------------------------------
# MGTR forward.
# ----------------------------------------------------------------------------
def mgtr_forward(src_nchw, pos_nchw, prep, num_dec_layers=2, aux_loss=False):
    """src_nchw: backbone feature map [B, C_in, Hf, Wf] (PyTorch NCHW).
    pos_nchw:  positional encoding  [B, D,   Hf, Wf].
    prep:      output of prepare_mgtr_params()."""
    B, Cin, H, W = src_nchw.shape
    D = prep["D"]
    Q = prep["query_embed"].shape[0]
    HW = H * W

    # NCHW -> channels-last / flattened-rows glue (plain JAX).
    src2d = jnp.transpose(src_nchw, (0, 2, 3, 1)).reshape(B * HW, Cin)
    pos_flat = jnp.transpose(pos_nchw, (0, 2, 3, 1)).reshape(B, HW, D)

    # Pallas kernel 1: 1x1 conv projection (row-tiled matmul, bf16 writeback).
    memory = input_proj(src2d, prep["proj_w"], prep["proj_b"])
    memory = memory.reshape(B, HW, D)

    # TODO(synk): backbone and transformer are external modules passed into
    # MGTR.__init__ (not defined in mgtr.py); a deterministic stand-in below
    # produces hs with the correct shape [n_dec_layers, B, num_queries, D].
    pooled = jnp.mean(memory.astype(jnp.float32) + pos_flat, axis=1)  # [B, D]
    layer_scale = (jnp.arange(num_dec_layers, dtype=jnp.float32) + 1.0) / num_dec_layers
    hs = jnp.tanh(
        prep["query_embed"][None, None, :, :]
        + pooled[None, :, None, :] * layer_scale[:, None, None, None]
    )  # [L, B, Q, D] f32

    L = num_dec_layers
    # Cast hs to bf16 exactly once; no intermediate f32 round-trip.
    hs_flat = hs.astype(jnp.bfloat16).reshape(L * B * Q, D)

    # Pallas kernel 2: fused prediction heads.
    p1_logits, p1_boxes, p2_logits, p2_boxes, a_logits = run_heads(hs_flat, prep)

    C1, A1 = prep["C1"], prep["A1"]
    p1_logits = p1_logits.reshape(L, B, Q, C1)
    p1_boxes = p1_boxes.reshape(L, B, Q, 4)
    p2_logits = p2_logits.reshape(L, B, Q, C1)
    p2_boxes = p2_boxes.reshape(L, B, Q, 4)
    a_logits = a_logits.reshape(L, B, Q, A1)

    out = {
        "person1_pred_logits": p1_logits[-1],
        "person1_pred_boxes": p1_boxes[-1],
        "person2_pred_logits": p2_logits[-1],
        "person2_pred_boxes": p2_boxes[-1],
        "action_pred_logits": a_logits[-1],
    }
    if aux_loss:
        out["aux_outputs"] = [
            {
                "person1_pred_logits": a,
                "person1_pred_boxes": b,
                "person2_pred_logits": c,
                "person2_pred_boxes": d,
                "action_pred_logits": e,
            }
            for a, b, c, d, e in zip(
                p1_logits[:-1], p1_boxes[:-1], p2_logits[:-1],
                p2_boxes[:-1], a_logits[:-1],
            )
        ]
    return out


if __name__ == "__main__":
    # Small, consistent shapes.
    B, C_BACKBONE, HF, WF_ = 2, 4, 8, 8
    HIDDEN = 32
    NUM_QUERIES = 8
    NUM_CLASSES = 3
    NUM_ACTIONS = 5
    NUM_DEC_LAYERS = 2

    key = jax.random.PRNGKey(0)
    k_src, k_pos, k_param = jax.random.split(key, 3)

    src = jax.random.normal(k_src, (B, C_BACKBONE, HF, WF_), jnp.float32)
    pos = jax.random.normal(k_pos, (B, HIDDEN, HF, WF_), jnp.float32)
    params = make_params(
        k_param, C_BACKBONE, HIDDEN, NUM_CLASSES, NUM_ACTIONS, NUM_QUERIES
    )
    prep = prepare_mgtr_params(params)   # one-time weight packing / bf16 cast

    out = mgtr_forward(src, pos, prep, num_dec_layers=NUM_DEC_LAYERS,
                       aux_loss=True)
    jax.block_until_ready(out)

    # Sanity on shapes and values.
    assert out["person1_pred_logits"].shape == (B, NUM_QUERIES, NUM_CLASSES + 1)
    assert out["person1_pred_boxes"].shape == (B, NUM_QUERIES, 4)
    assert out["person2_pred_logits"].shape == (B, NUM_QUERIES, NUM_CLASSES + 1)
    assert out["person2_pred_boxes"].shape == (B, NUM_QUERIES, 4)
    assert out["action_pred_logits"].shape == (B, NUM_QUERIES, NUM_ACTIONS + 1)
    assert len(out["aux_outputs"]) == NUM_DEC_LAYERS - 1
    assert bool(jnp.all(jnp.isfinite(out["person1_pred_boxes"])))
    assert bool(jnp.all((out["person1_pred_boxes"] >= 0.0)
                        & (out["person1_pred_boxes"] <= 1.0)))
    assert bool(jnp.all(jnp.isfinite(out["action_pred_logits"])))

    print("KERNEL_OK")
</pallas_src>

<mosaic_0001>
module attributes {stable_mosaic.version = 11 : i64} {
  func.func @_input_proj_kernel(%arg0: i32, %arg1: memref<64x4xbf16, #tpu.memory_space<vmem>>, %arg2: memref<4x32xbf16, #tpu.memory_space<vmem>>, %arg3: memref<1x32xf32, #tpu.memory_space<vmem>>, %arg4: memref<64x32xbf16, #tpu.memory_space<vmem>>) attributes {dimension_semantics = [#tpu.dimension_semantics<parallel>], iteration_bounds = array<i64: 2>, scalar_prefetch = 0 : i64, scratch_operands = 0 : i64, tpu.core_type = #tpu.core_type<tc>, window_params = [{transform_indices = @transform_0, window_bounds = array<i64: 64, 4>}, {pipeline_mode = #tpu.pipeline_mode<synchronous>, transform_indices = @transform_1, window_bounds = array<i64: 4, 32>}, {pipeline_mode = #tpu.pipeline_mode<synchronous>, transform_indices = @transform_2, window_bounds = array<i64: 1, 32>}, {transform_indices = @transform_3, window_bounds = array<i64: 64, 32>}]} {
    %c0 = arith.constant 0 : index
    %c0_0 = arith.constant 0 : index
    %0 = vector.load %arg1[%c0, %c0_0] : memref<64x4xbf16, #tpu.memory_space<vmem>>, vector<64x4xbf16>
    %c0_1 = arith.constant 0 : index
    %c0_2 = arith.constant 0 : index
    %1 = vector.load %arg2[%c0_1, %c0_2] : memref<4x32xbf16, #tpu.memory_space<vmem>>, vector<4x32xbf16>
    %cst = arith.constant dense<0.000000e+00> : vector<64x32xf32>
    %2 = tpu.matmul %0, %1, %cst {dimension_numbers = #tpu.dot_dimension_numbers<[1], [0], [0], [1], [0, 0, 1, 1], [], []>} : vector<64x4xbf16>, vector<4x32xbf16>, vector<64x32xf32> -> vector<64x32xf32>
    %c0_3 = arith.constant 0 : index
    %c0_4 = arith.constant 0 : index
    %3 = vector.load %arg3[%c0_3, %c0_4] : memref<1x32xf32, #tpu.memory_space<vmem>>, vector<1x32xf32>
    %4 = vector.broadcast %3 : vector<1x32xf32> to vector<64x32xf32>
    %5 = arith.addf %2, %4 : vector<64x32xf32>
    %6 = arith.truncf %5 : vector<64x32xf32> to vector<64x32xbf16>
    %c0_5 = arith.constant 0 : index
    %c0_6 = arith.constant 0 : index
    %7 = vector.load %arg4[%c0_5, %c0_6] : memref<64x32xbf16, #tpu.memory_space<vmem>>, vector<64x32xbf16>
    tpu.vector_store %arg4[%c0_5, %c0_6], %6 {strides = array<i32>} : memref<64x32xbf16, #tpu.memory_space<vmem>>, vector<64x32xbf16>,
    return
  }
  func.func @transform_0(%arg0: i32) -> (i32, i32) {
    %c0_i32 = arith.constant 0 : i32
    %c0_i32_0 = arith.constant 0 : i32
    return %arg0, %c0_i32 : i32, i32
  }
  func.func @transform_1(%arg0: i32) -> (i32, i32) {
    %c0_i32 = arith.constant 0 : i32
    %c0_i32_0 = arith.constant 0 : i32
    %c0_i32_1 = arith.constant 0 : i32
    return %c0_i32, %c0_i32_0 : i32, i32
  }
  func.func @transform_2(%arg0: i32) -> (i32, i32) {
    %c0_i32 = arith.constant 0 : i32
    %c0_i32_0 = arith.constant 0 : i32
    %c0_i32_1 = arith.constant 0 : i32
    return %c0_i32, %c0_i32_0 : i32, i32
  }
  func.func @transform_3(%arg0: i32) -> (i32, i32) {
    %c0_i32 = arith.constant 0 : i32
    %c0_i32_0 = arith.constant 0 : i32
    return %arg0, %c0_i32 : i32, i32
  }
}

</mosaic_0001>

<bundles_post_ra>
// kernel: tpu_custom_call.1
= control target key start
LH: loop header
LB: loop body
LE: loop exit
PB: predicated region body
PF: predicated region fallthrough
CT: control target
= control target key end

     0   :  { %s485_s12 = smov 0   ;;  %s516_s0 = inlined_call_operand.vmem [shape: bf16[128,4], index: 0, kind: input, shape index: {}]   ;;  %s517_s1 = inlined_call_operand.vmem [shape: bf16[4,32], index: 1, kind: input, shape index: {}]   ;;  %s518_s2 = inlined_call_operand.vmem [shape: f32[1,32], index: 2, kind: input, shape index: {}]   ;;  %s519_s3 = inlined_call_operand.vmem [shape: bf16[128,32], index: 3, kind: output, shape index: {}]  }
   0x1 LB: > { %s390_s13 = sadd.s32 4294967295, %s463_s12   ;;  %p394_p0 = scmp.ge.s32.totalorder %s463_s12, 1  ;;  %s463_s12 = sphi %s485_s12, %s13_s12  }
   0x2   : > { %p138_p1 = scmp.lt.s32.totalorder %s463_s12, 3 }
   0x4   : > { %p139_p2 = pnand %p394_p0, %p138_p1 }
   0x5   : > { %s395_s16 = sshll.u32 (!%p139_p2), %s390_s13, 3 }
   0x6   : > { %142 = sbr.rel (%p139_p2) target bundleno = 220 (0xdc), region = 32  ;;  %p163_p3 = scmp.lt.s32.totalorder (!%p139_p2), %s395_s16, 15 }
   0xb   : > { %v183_v0 = vld [vmem:[%s517_s1] sm:$0x3]  ;;  %vm224_vm0 = vcmask 1041408   ;;  %s521_s16 = smov (!%p163_p3, %s395_s16), 15  ;;  %vm211_vm1 = vcmask 31744   ;;  %vm325_vm2 = vcmask 257024  }
   0xc   : > { %443 = vmatprep.subr.msk.bf16.mxu0 %vm224_vm0, %v183_v0  ;;  %444 = vmatprep.subr.msk.bf16.mxu1 %vm224_vm0, %v183_v0  ;;  %v226_v1 = vsel %vm224_vm0, %v183_v0, 0  ;;  %s396_s17 = sshll.u32 %s521_s16, 2  ;;  %v399_v6 = vld [vmem:[%s518_s2] ss:$0 sm:$0xff] }
   0xd   : > { %432 = vmatpush3.bf16.msra.mxu0 %v226_v1  ;;  %442 = vmatpush3.bf16.msra.mxu1 %v226_v1  ;;  %s166_s20 = scalar_lea.vmem %s516_s0, %s396_s17  ;;  %s172_s25 = scalar_lea.vmem %s519_s3, %s396_s17 }
   0xe   : > { %v453_v2 = vld [vmem:[%s166_s20] sm:$0xff]   ;;  %v454_v3 = vld [vmem:[%s166_s20 + $0x10] sm:$0xff]   ;;  %v455_v4 = vld [vmem:[%s166_s20 + $0x8] sm:$0xff]  }
   0xf   : > { %433 = vmatprep.mubr.msk.bf16.mxu0 %vm211_vm1, %v453_v2  ;;  %437 = vmatprep.mubr.msk.bf16.mxu1 %vm211_vm1, %v454_v3  ;;  %v456_v5 = vld [vmem:[%s166_s20 + $0x18] sm:$0xff]  }
  0x10   : > { %434 = vmatmul.mubr.msk.bf16.vlgmr.msra.gmra.mxu0 %vm211_vm1, %v455_v4  ;;  %438 = vmatmul.mubr.msk.bf16.vlgmr.msra.gmra.mxu1 %vm211_vm1, %v456_v5 }
  0xd0   : > { %v435_v7 = vpop.f32.mrf.mxu0  ;;  %v439_v9 = vpop.f32.mrf.mxu1 }
  0xd1   : > { %v271_v8 = vadd.f32 %v435_v7, %v399_v6  ;;  %v287_v10 = vadd.f32 %v439_v9, %v399_v6 }
  0xd2   : > { %v262_v11 = vpop.f32.mrf.mxu0  ;;  %v278_v14 = vpop.f32.mrf.mxu1 }
  0xd3   : > { %v420_v12 = vpack.c.bf16 %v271_v8, %v271_v8  ;;  %v263_v13 = vadd.f32 %v399_v6, %v262_v11  ;;  %v424_v15 = vpack.c.bf16 %v287_v10, %v287_v10  ;;  %v279_v16 = vadd.f32 %v399_v6, %v278_v14 }
  0xd4   : > { %v436_v17 = vpop.f32.mrf.mxu0  ;;  %v440_v20 = vpop.f32.mrf.mxu1 }
  0xd5   : > { %328 = vst.msk [vmem:[%s172_s25 + $0x8] sm:$0xf] %vm325_vm2, %v420_v12  ;;  %v418_v18 = vpack.c.bf16 %v263_v13, %v263_v13  ;;  %v274_v19 = vadd.f32 %v436_v17, %v399_v6  ;;  %332 = vst.msk [vmem:[%s172_s25 + $0x18] sm:$0xf] %vm325_vm2, %v424_v15  ;;  %v422_v21 = vpack.c.bf16 %v279_v16, %v279_v16 }
  0xd6   : > { %v290_v22 = vadd.f32 %v440_v20, %v399_v6  ;;  %v265_v23 = vpop.f32.mrf.mxu0  ;;  %v281_v26 = vpop.f32.mrf.mxu1 }
  0xd7   : > { %326 = vst.msk [vmem:[%s172_s25] sm:$0xf] %vm325_vm2, %v418_v18  ;;  %v421_v24 = vpack.c.bf16 %v274_v19, %v274_v19  ;;  %v266_v25 = vadd.f32 %v399_v6, %v265_v23  ;;  %330 = vst.msk [vmem:[%s172_s25 + $0x10] sm:$0xf] %vm325_vm2, %v422_v21  ;;  %v282_v28 = vadd.f32 %v399_v6, %v281_v26 }
  0xd8   : > { %v425_v27 = vpack.c.bf16 %v290_v22, %v290_v22 }
  0xd9   : > { %329 = vst.msk [vmem:[%s172_s25 + $0xc] sm:$0xf] %vm325_vm2, %v421_v24  ;;  %v419_v29 = vpack.c.bf16 %v266_v25, %v266_v25  ;;  %v423_v30 = vpack.c.bf16 %v282_v28, %v282_v28 }
  0xda   : > { %333 = vst.msk [vmem:[%s172_s25 + $0x1c] sm:$0xf] %vm325_vm2, %v425_v27 }
  0xdb   : > { %327 = vst.msk [vmem:[%s172_s25 + $0x4] sm:$0xf] %vm325_vm2, %v419_v29  ;;  %331 = vst.msk [vmem:[%s172_s25 + $0x14] sm:$0xf] %vm325_vm2, %v423_v30 }
  0xdc PF: > { %s13_s12 = sadd.s32 1, %s463_s12  }
  0xdd   : > { %p10_p4 = scmp.ge.s32.totalorder %s13_s12, 4  }
  0xdf   :  { %12 = sbr.rel (!%p10_p4) target bundleno = 1 (0x1), region = 62 }

</bundles_post_ra>
